<compile_context>
chip_gen: v5e
topology: v5e:2x2
jax: 0.10.0
libtpu: 0.0.40
codegen_flags: <defaults>
</compile_context>

<pallas_src>
import functools

import jax
import jax.numpy as jnp
from jax.experimental import pallas as pl
from jax.experimental.pallas import tpu as pltpu

# ---- packed-parameter slab layout (f32 scalars, read from SMEM) ----------------------
IN_F, HID_F, OUT_F = 3, 10, 3
W1_OFF = 0                       # w1 (3,10)  flat index k*10 + j
B1_OFF = W1_OFF + IN_F * HID_F   # b1 (10,)
W2_OFF = B1_OFF + HID_F          # w2 (10,3)  flat index j*3 + i   (pre-scaled by 0.5)
B2_OFF = W2_OFF + HID_F * OUT_F  # b2 (3,)                          (pre-folded 0.5*(b2+1))
PARAM_LEN = B2_OFF + OUT_F       # = 73
PARAM_PAD = 128                  # padded SMEM slab length

LANES = 128                      # batch elements per lane row
SUB = 16                         # sublane rows per inner step (2 f32 vregs / 1 bf16 vreg)
DEFAULT_ROW_TILE = 1024          # sublane rows per grid step (~1.5 MB f32 input tile)


def mlp_kernel(params_ref, x_ref, o_ref):
    """params_ref: SMEM (PARAM_PAD,) f32 packed [w1, b1, 0.5*w2, 0.5*(b2+1)]
       x_ref:  VMEM (3, row_tile, 128)  -- batch on (sublane rows, lanes), lane-dense
       o_ref:  VMEM (3, row_tile, 128)
    """
    cdt = x_ref.dtype

    # Hoist only the layer-1 scalars (40 sregs, loop-invariant).  Layer-2 scalars are
    # re-read from SMEM inside the row loop: sld sits on the scalar slot which has slack
    # under the VALU-bound FMA chain, and this keeps the live scalar set well below the
    # scalar register file size (no per-iteration re-splat / spill risk).
    w1 = [params_ref[W1_OFF + k].astype(cdt) for k in range(IN_F * HID_F)]
    b1 = [params_ref[B1_OFF + j].astype(cdt) for j in range(HID_F)]

    n_sub = x_ref.shape[1] // SUB

    @pl.loop(0, n_sub)
    def _(r):
        r0 = pl.multiple_of(r * SUB, SUB)
        # One (16,128) slab per input feature: full sublane+lane occupancy.
        xk = [x_ref[k, pl.ds(r0, SUB), :] for k in range(IN_F)]

        ys = [None] * OUT_F
        for j in range(HID_F):
            # Layer 1 + ReLU: fully unrolled scalar*vector FMAs on the VPU.
            hj = (b1[j]
                  + w1[0 * HID_F + j] * xk[0]
                  + w1[1 * HID_F + j] * xk[1]
                  + w1[2 * HID_F + j] * xk[2])
            hj = jnp.maximum(hj, 0.0)
            # Layer 2 accumulation (w2 already pre-scaled by 0.5 at pack time).
            for i in range(OUT_F):
                t = params_ref[W2_OFF + j * OUT_F + i].astype(cdt) * hj
                ys[i] = t if ys[i] is None else ys[i] + t

        for i in range(OUT_F):
            # Epilogue folded at pack time:  (hardtanh(y) + 1) / 2  ==  clip(0.5*y + 0.5, 0, 1)
            #                                ==  clip(h @ (0.5*w2) + 0.5*(b2+1), 0, 1)
            yi = ys[i] + params_ref[B2_OFF + i].astype(cdt)
            o_ref[i, pl.ds(r0, SUB), :] = jnp.clip(yi, 0.0, 1.0)


def pack_params(w1, b1, w2, b2):
    """Pack [w1, b1, 0.5*w2, 0.5*(b2+1)] into one padded f32 SMEM slab (one transfer)."""
    w2f = 0.5 * w2
    b2f = 0.5 * (b2 + 1.0)
    flat = jnp.concatenate(
        [w1.reshape(-1), b1.reshape(-1), w2f.reshape(-1), b2f.reshape(-1)]
    ).astype(jnp.float32)
    return jnp.pad(flat, (0, PARAM_PAD - PARAM_LEN))


def _round_up(x, m):
    return ((x + m - 1) // m) * m


@functools.partial(jax.jit, static_argnames=("row_tile", "compute_dtype"))
def mlp_forward(x, w1, b1, w2, b2, *, row_tile=DEFAULT_ROW_TILE,
                compute_dtype=jnp.float32):
    """x: (B, 3).  Weights stored transposed vs. PyTorch: w1 (3,10), b1 (10,),
    w2 (10,3), b2 (3,), so the math is relu(x @ w1 + b1) @ w2 + b2, etc.
    compute_dtype=jnp.bfloat16 is the fast path for v6e/v7x (keep f32 on v5e)."""
    B = x.shape[0]
    params = pack_params(w1, b1, w2, b2)

    # Row tiling: pad only to SUB (not to the tile size) to avoid paying a whole extra
    # tile of DMA + compute for unlucky batch sizes; the ragged last grid step is handled
    # by Pallas block padding / masked writeback.
    rows_needed = pl.cdiv(B, LANES)
    rows = _round_up(max(rows_needed, 1), SUB)
    tr = _round_up(min(row_tile, rows), SUB)
    # Keep >= 2 grid steps whenever there is enough work, so both v7x TensorCores
    # (dimension_semantics=("parallel",)) get a share of the batch axis.
    if rows > SUB and pl.cdiv(rows, tr) < 2:
        tr = _round_up(pl.cdiv(rows, 2), SUB)
    n_steps = pl.cdiv(rows, tr)
    b_pad = rows * LANES

    # Layout plumbing: transpose the SMALL (B,3) array first, pad the long axis after.
    # TODO(synk): keep activations feature-major (3,B) end-to-end to drop both transposes.
    x_t = jnp.pad(x.astype(compute_dtype).T, ((0, 0), (0, b_pad - B)))
    x_t = x_t.reshape(IN_F, rows, LANES)            # (3, rows, 128), lane-dense

    out_t = pl.pallas_call(
        mlp_kernel,
        out_shape=jax.ShapeDtypeStruct((OUT_F, rows, LANES), compute_dtype),
        grid=(n_steps,),
        in_specs=[
            pl.BlockSpec(memory_space=pltpu.MemorySpace.SMEM),     # packed param slab
            pl.BlockSpec((IN_F, tr, LANES), lambda i: (0, i, 0)),  # x tile
        ],
        out_specs=pl.BlockSpec((OUT_F, tr, LANES), lambda i: (0, i, 0)),
        compiler_params=pltpu.CompilerParams(
            dimension_semantics=("parallel",),   # megacore / v7x 2-TC sharding over batch
        ),
    )(params, x_t)

    # Slice BEFORE transposing so the transpose only streams B*3 elements.
    return out_t.reshape(OUT_F, b_pad)[:, :B].T     # (B, 3)


def reference_forward(x, w1, b1, w2, b2):
    h = jnp.maximum(x @ w1 + b1, 0.0)
    y = jnp.clip(h @ w2 + b2, -1.0, 1.0)
    return (y + 1.0) * 0.5


if __name__ == "__main__":
    key = jax.random.PRNGKey(0)
    k_x, k_w1, k_b1, k_w2, k_b2 = jax.random.split(key, 5)

    bound1 = 1.0 / jnp.sqrt(3.0)    # PyTorch-style U(-1/sqrt(fan_in), 1/sqrt(fan_in))
    bound2 = 1.0 / jnp.sqrt(10.0)
    w1 = jax.random.uniform(k_w1, (IN_F, HID_F), minval=-bound1, maxval=bound1, dtype=jnp.float32)
    b1 = jax.random.uniform(k_b1, (HID_F,), minval=-bound1, maxval=bound1, dtype=jnp.float32)
    w2 = jax.random.uniform(k_w2, (IN_F if False else HID_F, OUT_F), minval=-bound2, maxval=bound2, dtype=jnp.float32)
    b2 = jax.random.uniform(k_b2, (OUT_F,), minval=-bound2, maxval=bound2, dtype=jnp.float32)

    # Small demo batch (single grid step).
    B = 16
    x = jax.random.normal(k_x, (B, IN_F), dtype=jnp.float32)
    out = jax.block_until_ready(mlp_forward(x, w1, b1, w2, b2))
    ref = reference_forward(x, w1, b1, w2, b2)
    assert out.shape == (B, OUT_F)
    assert jnp.allclose(out, ref, atol=1e-5, rtol=1e-5), float(jnp.max(jnp.abs(out - ref)))

    # Second check: multi-step grid with a ragged last tile (exercises the pad-waste fix).
    B2 = 5000
    x2 = jax.random.normal(k_x, (B2, IN_F), dtype=jnp.float32)
    out2 = jax.block_until_ready(mlp_forward(x2, w1, b1, w2, b2))
    ref2 = reference_forward(x2, w1, b1, w2, b2)
    assert out2.shape == (B2, OUT_F)
    assert jnp.allclose(out2, ref2, atol=1e-5, rtol=1e-5), float(jnp.max(jnp.abs(out2 - ref2)))

    print("KERNEL_OK")
</pallas_src>

<mosaic_0001>
module attributes {stable_mosaic.version = 11 : i64} {
  func.func @mlp_kernel(%arg0: i32, %arg1: memref<128xf32, #tpu.memory_space<smem>>, %arg2: memref<3x16x128xf32, #tpu.memory_space<vmem>>, %arg3: memref<3x16x128xf32, #tpu.memory_space<vmem>>) attributes {dimension_semantics = [#tpu.dimension_semantics<parallel>], iteration_bounds = array<i64: 1>, scalar_prefetch = 0 : i64, scratch_operands = 0 : i64, tpu.core_type = #tpu.core_type<tc>, window_params = [{transform_indices = @transform_0, window_bounds = array<i64: 128>}, {transform_indices = @transform_1, window_bounds = array<i64: 3, 16, 128>}, {transform_indices = @transform_2, window_bounds = array<i64: 3, 16, 128>}]} {
    %c0 = arith.constant 0 : index
    %0 = memref.load %arg1[%c0] : memref<128xf32, #tpu.memory_space<smem>>
    %c1 = arith.constant 1 : index
    %1 = memref.load %arg1[%c1] : memref<128xf32, #tpu.memory_space<smem>>
    %c2 = arith.constant 2 : index
    %2 = memref.load %arg1[%c2] : memref<128xf32, #tpu.memory_space<smem>>
    %c3 = arith.constant 3 : index
    %3 = memref.load %arg1[%c3] : memref<128xf32, #tpu.memory_space<smem>>
    %c4 = arith.constant 4 : index
    %4 = memref.load %arg1[%c4] : memref<128xf32, #tpu.memory_space<smem>>
    %c5 = arith.constant 5 : index
    %5 = memref.load %arg1[%c5] : memref<128xf32, #tpu.memory_space<smem>>
    %c6 = arith.constant 6 : index
    %6 = memref.load %arg1[%c6] : memref<128xf32, #tpu.memory_space<smem>>
    %c7 = arith.constant 7 : index
    %7 = memref.load %arg1[%c7] : memref<128xf32, #tpu.memory_space<smem>>
    %c8 = arith.constant 8 : index
    %8 = memref.load %arg1[%c8] : memref<128xf32, #tpu.memory_space<smem>>
    %c9 = arith.constant 9 : index
    %9 = memref.load %arg1[%c9] : memref<128xf32, #tpu.memory_space<smem>>
    %c10 = arith.constant 10 : index
    %10 = memref.load %arg1[%c10] : memref<128xf32, #tpu.memory_space<smem>>
    %c11 = arith.constant 11 : index
    %11 = memref.load %arg1[%c11] : memref<128xf32, #tpu.memory_space<smem>>
    %c12 = arith.constant 12 : index
    %12 = memref.load %arg1[%c12] : memref<128xf32, #tpu.memory_space<smem>>
    %c13 = arith.constant 13 : index
    %13 = memref.load %arg1[%c13] : memref<128xf32, #tpu.memory_space<smem>>
    %c14 = arith.constant 14 : index
    %14 = memref.load %arg1[%c14] : memref<128xf32, #tpu.memory_space<smem>>
    %c15 = arith.constant 15 : index
    %15 = memref.load %arg1[%c15] : memref<128xf32, #tpu.memory_space<smem>>
    %c16 = arith.constant 16 : index
    %16 = memref.load %arg1[%c16] : memref<128xf32, #tpu.memory_space<smem>>
    %c17 = arith.constant 17 : index
    %17 = memref.load %arg1[%c17] : memref<128xf32, #tpu.memory_space<smem>>
    %c18 = arith.constant 18 : index
    %18 = memref.load %arg1[%c18] : memref<128xf32, #tpu.memory_space<smem>>
    %c19 = arith.constant 19 : index
    %19 = memref.load %arg1[%c19] : memref<128xf32, #tpu.memory_space<smem>>
    %c20 = arith.constant 20 : index
    %20 = memref.load %arg1[%c20] : memref<128xf32, #tpu.memory_space<smem>>
    %c21 = arith.constant 21 : index
    %21 = memref.load %arg1[%c21] : memref<128xf32, #tpu.memory_space<smem>>
    %c22 = arith.constant 22 : index
    %22 = memref.load %arg1[%c22] : memref<128xf32, #tpu.memory_space<smem>>
    %c23 = arith.constant 23 : index
    %23 = memref.load %arg1[%c23] : memref<128xf32, #tpu.memory_space<smem>>
    %c24 = arith.constant 24 : index
    %24 = memref.load %arg1[%c24] : memref<128xf32, #tpu.memory_space<smem>>
    %c25 = arith.constant 25 : index
    %25 = memref.load %arg1[%c25] : memref<128xf32, #tpu.memory_space<smem>>
    %c26 = arith.constant 26 : index
    %26 = memref.load %arg1[%c26] : memref<128xf32, #tpu.memory_space<smem>>
    %c27 = arith.constant 27 : index
    %27 = memref.load %arg1[%c27] : memref<128xf32, #tpu.memory_space<smem>>
    %c28 = arith.constant 28 : index
    %28 = memref.load %arg1[%c28] : memref<128xf32, #tpu.memory_space<smem>>
    %c29 = arith.constant 29 : index
    %29 = memref.load %arg1[%c29] : memref<128xf32, #tpu.memory_space<smem>>
    %c30 = arith.constant 30 : index
    %30 = memref.load %arg1[%c30] : memref<128xf32, #tpu.memory_space<smem>>
    %c31 = arith.constant 31 : index
    %31 = memref.load %arg1[%c31] : memref<128xf32, #tpu.memory_space<smem>>
    %c32 = arith.constant 32 : index
    %32 = memref.load %arg1[%c32] : memref<128xf32, #tpu.memory_space<smem>>
    %c33 = arith.constant 33 : index
    %33 = memref.load %arg1[%c33] : memref<128xf32, #tpu.memory_space<smem>>
    %c34 = arith.constant 34 : index
    %34 = memref.load %arg1[%c34] : memref<128xf32, #tpu.memory_space<smem>>
    %c35 = arith.constant 35 : index
    %35 = memref.load %arg1[%c35] : memref<128xf32, #tpu.memory_space<smem>>
    %c36 = arith.constant 36 : index
    %36 = memref.load %arg1[%c36] : memref<128xf32, #tpu.memory_space<smem>>
    %c37 = arith.constant 37 : index
    %37 = memref.load %arg1[%c37] : memref<128xf32, #tpu.memory_space<smem>>
    %c38 = arith.constant 38 : index
    %38 = memref.load %arg1[%c38] : memref<128xf32, #tpu.memory_space<smem>>
    %c39 = arith.constant 39 : index
    %39 = memref.load %arg1[%c39] : memref<128xf32, #tpu.memory_space<smem>>
    %c0_i32 = arith.constant 0 : i32
    %c1_i32 = arith.constant 1 : i32
    %40 = arith.muli %c0_i32, %c1_i32 : i32
    %c0_i32_0 = arith.constant 0 : i32
    %41 = arith.addi %c0_i32_0, %40 : i32
    %c16_i32 = arith.constant 16 : i32
    %42 = arith.muli %41, %c16_i32 : i32
    %43 = tpu.assume_multiple %42, 16 : i32
    %c0_1 = arith.constant 0 : index
    %44 = arith.index_cast %43 : i32 to index
    %c0_2 = arith.constant 0 : index
    %45 = vector.load %arg2[%c0_1, %44, %c0_2] : memref<3x16x128xf32, #tpu.memory_space<vmem>>, vector<1x16x128xf32>
    %46 = vector.shape_cast %45 : vector<1x16x128xf32> to vector<16x128xf32>
    %c1_3 = arith.constant 1 : index
    %47 = arith.index_cast %43 : i32 to index
    %c0_4 = arith.constant 0 : index
    %48 = vector.load %arg2[%c1_3, %47, %c0_4] : memref<3x16x128xf32, #tpu.memory_space<vmem>>, vector<1x16x128xf32>
    %49 = vector.shape_cast %48 : vector<1x16x128xf32> to vector<16x128xf32>
    %c2_5 = arith.constant 2 : index
    %50 = arith.index_cast %43 : i32 to index
    %c0_6 = arith.constant 0 : index
    %51 = vector.load %arg2[%c2_5, %50, %c0_6] : memref<3x16x128xf32, #tpu.memory_space<vmem>>, vector<1x16x128xf32>
    %52 = vector.shape_cast %51 : vector<1x16x128xf32> to vector<16x128xf32>
    %53 = vector.broadcast %0 : f32 to vector<16x128xf32>
    %54 = arith.mulf %53, %46 : vector<16x128xf32>
    %55 = vector.broadcast %30 : f32 to vector<16x128xf32>
    %56 = arith.addf %55, %54 : vector<16x128xf32>
    %57 = vector.broadcast %10 : f32 to vector<16x128xf32>
    %58 = arith.mulf %57, %49 : vector<16x128xf32>
    %59 = arith.addf %56, %58 : vector<16x128xf32>
    %60 = vector.broadcast %20 : f32 to vector<16x128xf32>
    %61 = arith.mulf %60, %52 : vector<16x128xf32>
    %62 = arith.addf %59, %61 : vector<16x128xf32>
    %cst = arith.constant 0.000000e+00 : f32
    %63 = vector.broadcast %cst : f32 to vector<16x128xf32>
    %64 = arith.maximumf %62, %63 : vector<16x128xf32>
    %c40 = arith.constant 40 : index
    %65 = memref.load %arg1[%c40] : memref<128xf32, #tpu.memory_space<smem>>
    %66 = vector.broadcast %65 : f32 to vector<16x128xf32>
    %67 = arith.mulf %66, %64 : vector<16x128xf32>
    %c41 = arith.constant 41 : index
    %68 = memref.load %arg1[%c41] : memref<128xf32, #tpu.memory_space<smem>>
    %69 = vector.broadcast %68 : f32 to vector<16x128xf32>
    %70 = arith.mulf %69, %64 : vector<16x128xf32>
    %c42 = arith.constant 42 : index
    %71 = memref.load %arg1[%c42] : memref<128xf32, #tpu.memory_space<smem>>
    %72 = vector.broadcast %71 : f32 to vector<16x128xf32>
    %73 = arith.mulf %72, %64 : vector<16x128xf32>
    %74 = vector.broadcast %1 : f32 to vector<16x128xf32>
    %75 = arith.mulf %74, %46 : vector<16x128xf32>
    %76 = vector.broadcast %31 : f32 to vector<16x128xf32>
    %77 = arith.addf %76, %75 : vector<16x128xf32>
    %78 = vector.broadcast %11 : f32 to vector<16x128xf32>
    %79 = arith.mulf %78, %49 : vector<16x128xf32>
    %80 = arith.addf %77, %79 : vector<16x128xf32>
    %81 = vector.broadcast %21 : f32 to vector<16x128xf32>
    %82 = arith.mulf %81, %52 : vector<16x128xf32>
    %83 = arith.addf %80, %82 : vector<16x128xf32>
    %cst_7 = arith.constant 0.000000e+00 : f32
    %84 = vector.broadcast %cst_7 : f32 to vector<16x128xf32>
    %85 = arith.maximumf %83, %84 : vector<16x128xf32>
    %c43 = arith.constant 43 : index
    %86 = memref.load %arg1[%c43] : memref<128xf32, #tpu.memory_space<smem>>
    %87 = vector.broadcast %86 : f32 to vector<16x128xf32>
    %88 = arith.mulf %87, %85 : vector<16x128xf32>
    %89 = arith.addf %67, %88 : vector<16x128xf32>
    %c44 = arith.constant 44 : index
    %90 = memref.load %arg1[%c44] : memref<128xf32, #tpu.memory_space<smem>>
    %91 = vector.broadcast %90 : f32 to vector<16x128xf32>
    %92 = arith.mulf %91, %85 : vector<16x128xf32>
    %93 = arith.addf %70, %92 : vector<16x128xf32>
    %c45 = arith.constant 45 : index
    %94 = memref.load %arg1[%c45] : memref<128xf32, #tpu.memory_space<smem>>
    %95 = vector.broadcast %94 : f32 to vector<16x128xf32>
    %96 = arith.mulf %95, %85 : vector<16x128xf32>
    %97 = arith.addf %73, %96 : vector<16x128xf32>
    %98 = vector.broadcast %2 : f32 to vector<16x128xf32>
    %99 = arith.mulf %98, %46 : vector<16x128xf32>
    %100 = vector.broadcast %32 : f32 to vector<16x128xf32>
    %101 = arith.addf %100, %99 : vector<16x128xf32>
    %102 = vector.broadcast %12 : f32 to vector<16x128xf32>
    %103 = arith.mulf %102, %49 : vector<16x128xf32>
    %104 = arith.addf %101, %103 : vector<16x128xf32>
    %105 = vector.broadcast %22 : f32 to vector<16x128xf32>
    %106 = arith.mulf %105, %52 : vector<16x128xf32>
    %107 = arith.addf %104, %106 : vector<16x128xf32>
    %cst_8 = arith.constant 0.000000e+00 : f32
    %108 = vector.broadcast %cst_8 : f32 to vector<16x128xf32>
    %109 = arith.maximumf %107, %108 : vector<16x128xf32>
    %c46 = arith.constant 46 : index
    %110 = memref.load %arg1[%c46] : memref<128xf32, #tpu.memory_space<smem>>
    %111 = vector.broadcast %110 : f32 to vector<16x128xf32>
    %112 = arith.mulf %111, %109 : vector<16x128xf32>
    %113 = arith.addf %89, %112 : vector<16x128xf32>
    %c47 = arith.constant 47 : index
    %114 = memref.load %arg1[%c47] : memref<128xf32, #tpu.memory_space<smem>>
    %115 = vector.broadcast %114 : f32 to vector<16x128xf32>
    %116 = arith.mulf %115, %109 : vector<16x128xf32>
    %117 = arith.addf %93, %116 : vector<16x128xf32>
    %c48 = arith.constant 48 : index
    %118 = memref.load %arg1[%c48] : memref<128xf32, #tpu.memory_space<smem>>
    %119 = vector.broadcast %118 : f32 to vector<16x128xf32>
    %120 = arith.mulf %119, %109 : vector<16x128xf32>
    %121 = arith.addf %97, %120 : vector<16x128xf32>
    %122 = vector.broadcast %3 : f32 to vector<16x128xf32>
    %123 = arith.mulf %122, %46 : vector<16x128xf32>
    %124 = vector.broadcast %33 : f32 to vector<16x128xf32>
    %125 = arith.addf %124, %123 : vector<16x128xf32>
    %126 = vector.broadcast %13 : f32 to vector<16x128xf32>
    %127 = arith.mulf %126, %49 : vector<16x128xf32>
    %128 = arith.addf %125, %127 : vector<16x128xf32>
    %129 = vector.broadcast %23 : f32 to vector<16x128xf32>
    %130 = arith.mulf %129, %52 : vector<16x128xf32>
    %131 = arith.addf %128, %130 : vector<16x128xf32>
    %cst_9 = arith.constant 0.000000e+00 : f32
    %132 = vector.broadcast %cst_9 : f32 to vector<16x128xf32>
    %133 = arith.maximumf %131, %132 : vector<16x128xf32>
    %c49 = arith.constant 49 : index
    %134 = memref.load %arg1[%c49] : memref<128xf32, #tpu.memory_space<smem>>
    %135 = vector.broadcast %134 : f32 to vector<16x128xf32>
    %136 = arith.mulf %135, %133 : vector<16x128xf32>
    %137 = arith.addf %113, %136 : vector<16x128xf32>
    %c50 = arith.constant 50 : index
    %138 = memref.load %arg1[%c50] : memref<128xf32, #tpu.memory_space<smem>>
    %139 = vector.broadcast %138 : f32 to vector<16x128xf32>
    %140 = arith.mulf %139, %133 : vector<16x128xf32>
    %141 = arith.addf %117, %140 : vector<16x128xf32>
    %c51 = arith.constant 51 : index
    %142 = memref.load %arg1[%c51] : memref<128xf32, #tpu.memory_space<smem>>
    %143 = vector.broadcast %142 : f32 to vector<16x128xf32>
    %144 = arith.mulf %143, %133 : vector<16x128xf32>
    %145 = arith.addf %121, %144 : vector<16x128xf32>
    %146 = vector.broadcast %4 : f32 to vector<16x128xf32>
    %147 = arith.mulf %146, %46 : vector<16x128xf32>
    %148 = vector.broadcast %34 : f32 to vector<16x128xf32>
    %149 = arith.addf %148, %147 : vector<16x128xf32>
    %150 = vector.broadcast %14 : f32 to vector<16x128xf32>
    %151 = arith.mulf %150, %49 : vector<16x128xf32>
    %152 = arith.addf %149, %151 : vector<16x128xf32>
    %153 = vector.broadcast %24 : f32 to vector<16x128xf32>
    %154 = arith.mulf %153, %52 : vector<16x128xf32>
    %155 = arith.addf %152, %154 : vector<16x128xf32>
    %cst_10 = arith.constant 0.000000e+00 : f32
    %156 = vector.broadcast %cst_10 : f32 to vector<16x128xf32>
    %157 = arith.maximumf %155, %156 : vector<16x128xf32>
    %c52 = arith.constant 52 : index
    %158 = memref.load %arg1[%c52] : memref<128xf32, #tpu.memory_space<smem>>
    %159 = vector.broadcast %158 : f32 to vector<16x128xf32>
    %160 = arith.mulf %159, %157 : vector<16x128xf32>
    %161 = arith.addf %137, %160 : vector<16x128xf32>
    %c53 = arith.constant 53 : index
    %162 = memref.load %arg1[%c53] : memref<128xf32, #tpu.memory_space<smem>>
    %163 = vector.broadcast %162 : f32 to vector<16x128xf32>
    %164 = arith.mulf %163, %157 : vector<16x128xf32>
    %165 = arith.addf %141, %164 : vector<16x128xf32>
    %c54 = arith.constant 54 : index
    %166 = memref.load %arg1[%c54] : memref<128xf32, #tpu.memory_space<smem>>
    %167 = vector.broadcast %166 : f32 to vector<16x128xf32>
    %168 = arith.mulf %167, %157 : vector<16x128xf32>
    %169 = arith.addf %145, %168 : vector<16x128xf32>
    %170 = vector.broadcast %5 : f32 to vector<16x128xf32>
    %171 = arith.mulf %170, %46 : vector<16x128xf32>
    %172 = vector.broadcast %35 : f32 to vector<16x128xf32>
    %173 = arith.addf %172, %171 : vector<16x128xf32>
    %174 = vector.broadcast %15 : f32 to vector<16x128xf32>
    %175 = arith.mulf %174, %49 : vector<16x128xf32>
    %176 = arith.addf %173, %175 : vector<16x128xf32>
    %177 = vector.broadcast %25 : f32 to vector<16x128xf32>
    %178 = arith.mulf %177, %52 : vector<16x128xf32>
    %179 = arith.addf %176, %178 : vector<16x128xf32>
    %cst_11 = arith.constant 0.000000e+00 : f32
    %180 = vector.broadcast %cst_11 : f32 to vector<16x128xf32>
    %181 = arith.maximumf %179, %180 : vector<16x128xf32>
    %c55 = arith.constant 55 : index
    %182 = memref.load %arg1[%c55] : memref<128xf32, #tpu.memory_space<smem>>
    %183 = vector.broadcast %182 : f32 to vector<16x128xf32>
    %184 = arith.mulf %183, %181 : vector<16x128xf32>
    %185 = arith.addf %161, %184 : vector<16x128xf32>
    %c56 = arith.constant 56 : index
    %186 = memref.load %arg1[%c56] : memref<128xf32, #tpu.memory_space<smem>>
    %187 = vector.broadcast %186 : f32 to vector<16x128xf32>
    %188 = arith.mulf %187, %181 : vector<16x128xf32>
    %189 = arith.addf %165, %188 : vector<16x128xf32>
    %c57 = arith.constant 57 : index
    %190 = memref.load %arg1[%c57] : memref<128xf32, #tpu.memory_space<smem>>
    %191 = vector.broadcast %190 : f32 to vector<16x128xf32>
    %192 = arith.mulf %191, %181 : vector<16x128xf32>
    %193 = arith.addf %169, %192 : vector<16x128xf32>
    %194 = vector.broadcast %6 : f32 to vector<16x128xf32>
    %195 = arith.mulf %194, %46 : vector<16x128xf32>
    %196 = vector.broadcast %36 : f32 to vector<16x128xf32>
    %197 = arith.addf %196, %195 : vector<16x128xf32>
    %198 = vector.broadcast %16 : f32 to vector<16x128xf32>
    %199 = arith.mulf %198, %49 : vector<16x128xf32>
    %200 = arith.addf %197, %199 : vector<16x128xf32>
    %201 = vector.broadcast %26 : f32 to vector<16x128xf32>
    %202 = arith.mulf %201, %52 : vector<16x128xf32>
    %203 = arith.addf %200, %202 : vector<16x128xf32>
    %cst_12 = arith.constant 0.000000e+00 : f32
    %204 = vector.broadcast %cst_12 : f32 to vector<16x128xf32>
    %205 = arith.maximumf %203, %204 : vector<16x128xf32>
    %c58 = arith.constant 58 : index
    %206 = memref.load %arg1[%c58] : memref<128xf32, #tpu.memory_space<smem>>
    %207 = vector.broadcast %206 : f32 to vector<16x128xf32>
    %208 = arith.mulf %207, %205 : vector<16x128xf32>
    %209 = arith.addf %185, %208 : vector<16x128xf32>
    %c59 = arith.constant 59 : index
    %210 = memref.load %arg1[%c59] : memref<128xf32, #tpu.memory_space<smem>>
    %211 = vector.broadcast %210 : f32 to vector<16x128xf32>
    %212 = arith.mulf %211, %205 : vector<16x128xf32>
    %213 = arith.addf %189, %212 : vector<16x128xf32>
    %c60 = arith.constant 60 : index
    %214 = memref.load %arg1[%c60] : memref<128xf32, #tpu.memory_space<smem>>
    %215 = vector.broadcast %214 : f32 to vector<16x128xf32>
    %216 = arith.mulf %215, %205 : vector<16x128xf32>
    %217 = arith.addf %193, %216 : vector<16x128xf32>
    %218 = vector.broadcast %7 : f32 to vector<16x128xf32>
    %219 = arith.mulf %218, %46 : vector<16x128xf32>
    %220 = vector.broadcast %37 : f32 to vector<16x128xf32>
    %221 = arith.addf %220, %219 : vector<16x128xf32>
    %222 = vector.broadcast %17 : f32 to vector<16x128xf32>
    %223 = arith.mulf %222, %49 : vector<16x128xf32>
    %224 = arith.addf %221, %223 : vector<16x128xf32>
    %225 = vector.broadcast %27 : f32 to vector<16x128xf32>
    %226 = arith.mulf %225, %52 : vector<16x128xf32>
    %227 = arith.addf %224, %226 : vector<16x128xf32>
    %cst_13 = arith.constant 0.000000e+00 : f32
    %228 = vector.broadcast %cst_13 : f32 to vector<16x128xf32>
    %229 = arith.maximumf %227, %228 : vector<16x128xf32>
    %c61 = arith.constant 61 : index
    %230 = memref.load %arg1[%c61] : memref<128xf32, #tpu.memory_space<smem>>
    %231 = vector.broadcast %230 : f32 to vector<16x128xf32>
    %232 = arith.mulf %231, %229 : vector<16x128xf32>
    %233 = arith.addf %209, %232 : vector<16x128xf32>
    %c62 = arith.constant 62 : index
    %234 = memref.load %arg1[%c62] : memref<128xf32, #tpu.memory_space<smem>>
    %235 = vector.broadcast %234 : f32 to vector<16x128xf32>
    %236 = arith.mulf %235, %229 : vector<16x128xf32>
    %237 = arith.addf %213, %236 : vector<16x128xf32>
    %c63 = arith.constant 63 : index
    %238 = memref.load %arg1[%c63] : memref<128xf32, #tpu.memory_space<smem>>
    %239 = vector.broadcast %238 : f32 to vector<16x128xf32>
    %240 = arith.mulf %239, %229 : vector<16x128xf32>
    %241 = arith.addf %217, %240 : vector<16x128xf32>
    %242 = vector.broadcast %8 : f32 to vector<16x128xf32>
    %243 = arith.mulf %242, %46 : vector<16x128xf32>
    %244 = vector.broadcast %38 : f32 to vector<16x128xf32>
    %245 = arith.addf %244, %243 : vector<16x128xf32>
    %246 = vector.broadcast %18 : f32 to vector<16x128xf32>
    %247 = arith.mulf %246, %49 : vector<16x128xf32>
    %248 = arith.addf %245, %247 : vector<16x128xf32>
    %249 = vector.broadcast %28 : f32 to vector<16x128xf32>
    %250 = arith.mulf %249, %52 : vector<16x128xf32>
    %251 = arith.addf %248, %250 : vector<16x128xf32>
    %cst_14 = arith.constant 0.000000e+00 : f32
    %252 = vector.broadcast %cst_14 : f32 to vector<16x128xf32>
    %253 = arith.maximumf %251, %252 : vector<16x128xf32>
    %c64 = arith.constant 64 : index
    %254 = memref.load %arg1[%c64] : memref<128xf32, #tpu.memory_space<smem>>
    %255 = vector.broadcast %254 : f32 to vector<16x128xf32>
    %256 = arith.mulf %255, %253 : vector<16x128xf32>
    %257 = arith.addf %233, %256 : vector<16x128xf32>
    %c65 = arith.constant 65 : index
    %258 = memref.load %arg1[%c65] : memref<128xf32, #tpu.memory_space<smem>>
    %259 = vector.broadcast %258 : f32 to vector<16x128xf32>
    %260 = arith.mulf %259, %253 : vector<16x128xf32>
    %261 = arith.addf %237, %260 : vector<16x128xf32>
    %c66 = arith.constant 66 : index
    %262 = memref.load %arg1[%c66] : memref<128xf32, #tpu.memory_space<smem>>
    %263 = vector.broadcast %262 : f32 to vector<16x128xf32>
    %264 = arith.mulf %263, %253 : vector<16x128xf32>
    %265 = arith.addf %241, %264 : vector<16x128xf32>
    %266 = vector.broadcast %9 : f32 to vector<16x128xf32>
    %267 = arith.mulf %266, %46 : vector<16x128xf32>
    %268 = vector.broadcast %39 : f32 to vector<16x128xf32>
    %269 = arith.addf %268, %267 : vector<16x128xf32>
    %270 = vector.broadcast %19 : f32 to vector<16x128xf32>
    %271 = arith.mulf %270, %49 : vector<16x128xf32>
    %272 = arith.addf %269, %271 : vector<16x128xf32>
    %273 = vector.broadcast %29 : f32 to vector<16x128xf32>
    %274 = arith.mulf %273, %52 : vector<16x128xf32>
    %275 = arith.addf %272, %274 : vector<16x128xf32>
    %cst_15 = arith.constant 0.000000e+00 : f32
    %276 = vector.broadcast %cst_15 : f32 to vector<16x128xf32>
    %277 = arith.maximumf %275, %276 : vector<16x128xf32>
    %c67 = arith.constant 67 : index
    %278 = memref.load %arg1[%c67] : memref<128xf32, #tpu.memory_space<smem>>
    %279 = vector.broadcast %278 : f32 to vector<16x128xf32>
    %280 = arith.mulf %279, %277 : vector<16x128xf32>
    %281 = arith.addf %257, %280 : vector<16x128xf32>
    %c68 = arith.constant 68 : index
    %282 = memref.load %arg1[%c68] : memref<128xf32, #tpu.memory_space<smem>>
    %283 = vector.broadcast %282 : f32 to vector<16x128xf32>
    %284 = arith.mulf %283, %277 : vector<16x128xf32>
    %285 = arith.addf %261, %284 : vector<16x128xf32>
    %c69 = arith.constant 69 : index
    %286 = memref.load %arg1[%c69] : memref<128xf32, #tpu.memory_space<smem>>
    %287 = vector.broadcast %286 : f32 to vector<16x128xf32>
    %288 = arith.mulf %287, %277 : vector<16x128xf32>
    %289 = arith.addf %265, %288 : vector<16x128xf32>
    %c70 = arith.constant 70 : index
    %290 = memref.load %arg1[%c70] : memref<128xf32, #tpu.memory_space<smem>>
    %291 = vector.broadcast %290 : f32 to vector<16x128xf32>
    %292 = arith.addf %281, %291 : vector<16x128xf32>
    %cst_16 = arith.constant 0.000000e+00 : f32
    %cst_17 = arith.constant 1.000000e+00 : f32
    %293 = vector.broadcast %cst_16 : f32 to vector<16x128xf32>
    %294 = arith.maximumf %293, %292 : vector<16x128xf32>
    %295 = vector.broadcast %cst_17 : f32 to vector<16x128xf32>
    %296 = arith.minimumf %295, %294 : vector<16x128xf32>
    %c0_18 = arith.constant 0 : index
    %297 = arith.index_cast %43 : i32 to index
    %c0_19 = arith.constant 0 : index
    %298 = vector.load %arg3[%c0_18, %297, %c0_19] : memref<3x16x128xf32, #tpu.memory_space<vmem>>, vector<1x16x128xf32>
    %299 = vector.shape_cast %298 : vector<1x16x128xf32> to vector<16x128xf32>
    %300 = vector.shape_cast %296 : vector<16x128xf32> to vector<1x16x128xf32>
    tpu.vector_store %arg3[%c0_18, %297, %c0_19], %300 {strides = array<i32>} : memref<3x16x128xf32, #tpu.memory_space<vmem>>, vector<1x16x128xf32>,
    %c71 = arith.constant 71 : index
    %301 = memref.load %arg1[%c71] : memref<128xf32, #tpu.memory_space<smem>>
    %302 = vector.broadcast %301 : f32 to vector<16x128xf32>
    %303 = arith.addf %285, %302 : vector<16x128xf32>
    %cst_20 = arith.constant 0.000000e+00 : f32
    %cst_21 = arith.constant 1.000000e+00 : f32
    %304 = vector.broadcast %cst_20 : f32 to vector<16x128xf32>
    %305 = arith.maximumf %304, %303 : vector<16x128xf32>
    %306 = vector.broadcast %cst_21 : f32 to vector<16x128xf32>
    %307 = arith.minimumf %306, %305 : vector<16x128xf32>
    %c1_22 = arith.constant 1 : index
    %308 = arith.index_cast %43 : i32 to index
    %c0_23 = arith.constant 0 : index
    %309 = vector.load %arg3[%c1_22, %308, %c0_23] : memref<3x16x128xf32, #tpu.memory_space<vmem>>, vector<1x16x128xf32>
    %310 = vector.shape_cast %309 : vector<1x16x128xf32> to vector<16x128xf32>
    %311 = vector.shape_cast %307 : vector<16x128xf32> to vector<1x16x128xf32>
    tpu.vector_store %arg3[%c1_22, %308, %c0_23], %311 {strides = array<i32>} : memref<3x16x128xf32, #tpu.memory_space<vmem>>, vector<1x16x128xf32>,
    %c72 = arith.constant 72 : index
    %312 = memref.load %arg1[%c72] : memref<128xf32, #tpu.memory_space<smem>>
    %313 = vector.broadcast %312 : f32 to vector<16x128xf32>
    %314 = arith.addf %289, %313 : vector<16x128xf32>
    %cst_24 = arith.constant 0.000000e+00 : f32
    %cst_25 = arith.constant 1.000000e+00 : f32
    %315 = vector.broadcast %cst_24 : f32 to vector<16x128xf32>
    %316 = arith.maximumf %315, %314 : vector<16x128xf32>
    %317 = vector.broadcast %cst_25 : f32 to vector<16x128xf32>
    %318 = arith.minimumf %317, %316 : vector<16x128xf32>
    %c2_26 = arith.constant 2 : index
    %319 = arith.index_cast %43 : i32 to index
    %c0_27 = arith.constant 0 : index
    %320 = vector.load %arg3[%c2_26, %319, %c0_27] : memref<3x16x128xf32, #tpu.memory_space<vmem>>, vector<1x16x128xf32>
    %321 = vector.shape_cast %320 : vector<1x16x128xf32> to vector<16x128xf32>
    %322 = vector.shape_cast %318 : vector<16x128xf32> to vector<1x16x128xf32>
    tpu.vector_store %arg3[%c2_26, %319, %c0_27], %322 {strides = array<i32>} : memref<3x16x128xf32, #tpu.memory_space<vmem>>, vector<1x16x128xf32>,
    %c1_i32_28 = arith.constant 1 : i32
    return
  }
  func.func @transform_0(%arg0: i32) -> i32 {
    %c0_i32 = arith.constant 0 : i32
    %c0_i32_0 = arith.constant 0 : i32
    return %c0_i32 : i32
  }
  func.func @transform_1(%arg0: i32) -> (i32, i32, i32) {
    %c0_i32 = arith.constant 0 : i32
    %c0_i32_0 = arith.constant 0 : i32
    %c0_i32_1 = arith.constant 0 : i32
    return %c0_i32, %arg0, %c0_i32_0 : i32, i32, i32
  }
  func.func @transform_2(%arg0: i32) -> (i32, i32, i32) {
    %c0_i32 = arith.constant 0 : i32
    %c0_i32_0 = arith.constant 0 : i32
    %c0_i32_1 = arith.constant 0 : i32
    return %c0_i32, %arg0, %c0_i32_0 : i32, i32, i32
  }
}

</mosaic_0001>

<bundles_post_ra>
// kernel: mlp_forward.1
= control target key start
LH: loop header
LB: loop body
LE: loop exit
PB: predicated region body
PF: predicated region fallthrough
CT: control target
= control target key end

     0   :  { %7 = vsyncpa [#allocation3], 0  ;;  %s564_s12 = smov [#allocation2]   ;;  %s971_s0 = inlined_call_operand.vmem [shape: f32[128], index: 0, kind: input, shape index: {}]   ;;  %s972_s1 = inlined_call_operand.vmem [shape: f32[3,16,128], index: 1, kind: input, shape index: {}]   ;;  %s973_s2 = inlined_call_operand.vmem [shape: f32[3,16,128], index: 2, kind: output, shape index: {}]  }
   0x1   :  { %s13_s11 = sshll.u32 %s971_s0, 4  ;;  %s14_s11 = int_to_ptr.vmem [resolvable:$true] %s13_s11 }
   0x2   :  { %16 = dma.vmem_to_smem %s14_s11, 16, %s564_s12, [#allocation3]  }
   0x3   :  { %562 = dma.done.wait [#allocation3], 16  }
   0x4   :  { %563 = vsyncadd [#allocation3], 4294967280 }
   0x5   :  { %23 = sfence }
   0x6   :  { %s24_s13 = sld [smem:[#allocation2]]  ;;  %v608_v0 = vld [vmem:[%s972_s1] sm:$0xff]  ;;  %v613_v1 = vld [vmem:[%s972_s1 + $0x8] sm:$0xff]  ;;  %v620_v5 = vld [vmem:[%s972_s1 + $0x10] sm:$0xff] }
   0x7   :  { %s469_s14 = sld [smem:[#allocation2 + $0x1]]  ;;  %v627_v8 = vld [vmem:[%s972_s1 + $0x18] sm:$0xff]  ;;  %v666_v29 = vld [vmem:[%s972_s1 + $0x20] sm:$0xff]  ;;  %v671_v30 = vld [vmem:[%s972_s1 + $0x28] sm:$0xff] }
   0x8   :  { %s470_s15 = sld [smem:[#allocation2 + $0x2]] }
   0x9   :  { %s583_s16 = sld [smem:[#allocation2 + $0x3]] }
   0xa   :  { %s585_s17 = sld [smem:[#allocation2 + $0x4]] }
   0xb   :  { %s587_s18 = sld [smem:[#allocation2 + $0x5]] }
   0xc   :  { %s589_s19 = sld [smem:[#allocation2 + $0xa]]  ;;  %v74_v2 = vstv %s24_s13 }
   0xd   :  { %s591_s0 = sld [smem:[#allocation2 + $0xb]]  ;;  %v104_v3 = vstv %s469_s14  ;;  %v75_v9 = vmul.f32 %v74_v2, %v608_v0  ;;  %v76_v10 = vmul.f32 %v74_v2, %v613_v1 }
   0xe   :  { %s593_s20 = sld [smem:[#allocation2 + $0xc]]  ;;  %v140_v4 = vstv %s470_s15  ;;  %v105_v11 = vmul.f32 %v104_v3, %v608_v0  ;;  %v106_v13 = vmul.f32 %v104_v3, %v613_v1 }
   0xf   :  { %s595_s21 = sld [smem:[#allocation2 + $0xd]]  ;;  %v176_v7 = vstv %s583_s16  ;;  %v141_v14 = vmul.f32 %v140_v4, %v608_v0  ;;  %v142_v15 = vmul.f32 %v140_v4, %v613_v1 }
  0x10   :  { %s597_s22 = sld [smem:[#allocation2 + $0xe]]  ;;  %v643_v18 = vmul.f32 %v176_v7, %v608_v0  ;;  %v646_v19 = vmul.f32 %v176_v7, %v613_v1  ;;  %v212_v24 = vstv %s585_s17 }
  0x11   :  { %s599_s23 = sld [smem:[#allocation2 + $0x14]]  ;;  %v248_v28 = vstv %s587_s18  ;;  %v686_v37 = vmul.f32 %v212_v24, %v608_v0  ;;  %v689_v38 = vmul.f32 %v212_v24, %v613_v1 }
  0x12   :  { %s601_s24 = sld [smem:[#allocation2 + $0x15]]  ;;  %v80_v6 = vstv %s589_s19  ;;  %v700_v41 = vmul.f32 %v248_v28, %v608_v0  ;;  %v703_v42 = vmul.f32 %v248_v28, %v613_v1 }
  0x13   :  { %s603_s25 = sld [smem:[#allocation2 + $0x16]]  ;;  %v110_v12 = vstv %s591_s0  ;;  %v81_v17 = vmul.f32 %v620_v5, %v80_v6  ;;  %v82_v21 = vmul.f32 %v627_v8, %v80_v6 }
  0x14   :  { %s615_s30 = sld [smem:[#allocation2 + $0x17]]  ;;  %v146_v16 = vstv %s593_s20  ;;  %v111_v22 = vmul.f32 %v620_v5, %v110_v12  ;;  %v112_v23 = vmul.f32 %v627_v8, %v110_v12 }
  0x15   :  { %s633_s7 = sld [smem:[#allocation2 + $0xf]]  ;;  %v182_v20 = vstv %s595_s21  ;;  %v147_v25 = vmul.f32 %v620_v5, %v146_v16  ;;  %v148_v26 = vmul.f32 %v627_v8, %v146_v16 }
  0x16   :  { %s639_s8 = sld [smem:[#allocation2 + $0x18]]  ;;  %v218_v27 = vstv %s597_s22  ;;  %v676_v33 = vmul.f32 %v620_v5, %v182_v20  ;;  %v679_v34 = vmul.f32 %v627_v8, %v182_v20 }
  0x17   :  { %s649_s9 = sld [smem:[#allocation2 + $0x1e]]  ;;  %v85_v31 = vstv %s599_s23  ;;  %v694_v39 = vmul.f32 %v620_v5, %v218_v27  ;;  %v697_v40 = vmul.f32 %v627_v8, %v218_v27 }
  0x18   :  { %s655_s10 = sld [smem:[#allocation2 + $0x1f]]  ;;  %v115_v32 = vstv %s601_s24  ;;  %v86_v43 = vmul.f32 %v666_v29, %v85_v31  ;;  %v87_v44 = vmul.f32 %v671_v30, %v85_v31 }
  0x19   :  { %s661_s11 = sld [smem:[#allocation2 + $0x20]]  ;;  %v151_v35 = vstv %s603_s25  ;;  %v116_v45 = vmul.f32 %v666_v29, %v115_v32  ;;  %v117_v46 = vmul.f32 %v671_v30, %v115_v32 }
  0x1a   :  { %s681_s16 = sld [smem:[#allocation2 + $0x21]]  ;;  %v187_v36 = vstv %s615_s30  ;;  %v152_v48 = vmul.f32 %v666_v29, %v151_v35  ;;  %v153_v49 = vmul.f32 %v671_v30, %v151_v35 }
  0x1b   :  { %s691_s1 = sld [smem:[#allocation2 + $0x19]]  ;;  %v717_v50 = vmul.f32 %v666_v29, %v187_v36  ;;  %v189_v54 = vmul.f32 %v671_v30, %v187_v36  ;;  %v254_v4 = vstv %s633_s7 }
  0x1c   :  { %s705_s17 = sld [smem:[#allocation2 + $0x6]]  ;;  %v223_v58 = vstv %s639_s8  ;;  %v747_v16 = vmul.f32 %v620_v5, %v254_v4 }
  0x1d   :  { %s711_s18 = sld [smem:[#allocation2 + $0x22]]  ;;  %v77_v47 = vstv %s649_s9 }
  0x1e   :  { %s719_s19 = sld [smem:[#allocation2 + $0x10]]  ;;  %v78_v51 = vadd.f32 %v77_v47, %v75_v9  ;;  %v79_v52 = vadd.f32 %v77_v47, %v76_v10  ;;  %v107_v53 = vstv %s655_s10  ;;  %v734_v9 = vmul.f32 %v666_v29, %v223_v58 }
  0x1f   :  { %v108_v55 = vadd.f32 %v107_v53, %v105_v11  ;;  %v109_v56 = vadd.f32 %v107_v53, %v106_v13  ;;  %v143_v57 = vstv %s661_s11  ;;  %s725_s0 = sld [smem:[#allocation2 + $0x23]]  ;;  %v737_v10 = vmul.f32 %v671_v30, %v223_v58 }
  0x20   :  { %v83_v59 = vadd.f32 %v81_v17, %v78_v51  ;;  %v84_v60 = vadd.f32 %v82_v21, %v79_v52  ;;  %v144_v61 = vadd.f32 %v143_v57, %v141_v14  ;;  %v145_v62 = vadd.f32 %v143_v57, %v142_v15  ;;  %s727_s20 = sld [smem:[#allocation2 + $0x28]] }
  0x21   :  { %v113_v63 = vadd.f32 %v111_v22, %v108_v55  ;;  %v114_v2 = vadd.f32 %v112_v23, %v109_v56  ;;  %v179_v3 = vstv %s681_s16  ;;  %s731_s21 = sld [smem:[#allocation2 + $0x29]]  ;;  %v259_v14 = vstv %s691_s1 }
  0x22   :  { %v149_v6 = vadd.f32 %v147_v25, %v144_v61  ;;  %v150_v7 = vadd.f32 %v148_v26, %v145_v62  ;;  %v88_v11 = vadd.f32 %v86_v43, %v83_v59  ;;  %s739_s22 = sld [smem:[#allocation2 + $0x2a]]  ;;  %v180_v12 = vadd.f32 %v179_v3, %v643_v18 }
  0x23   :  { %v181_v13 = vadd.f32 %v179_v3, %v646_v19  ;;  %v89_v15 = vadd.f32 %v87_v44, %v84_v60  ;;  %s744_s23 = sld [smem:[#allocation2 + $0x2b]]  ;;  %v750_v17 = vmul.f32 %v627_v8, %v254_v4  ;;  %v284_v20 = vstv %s705_s17 }
  0x24   :  { %v118_v21 = vadd.f32 %v116_v45, %v113_v63  ;;  %v119_v22 = vadd.f32 %v117_v46, %v114_v2  ;;  %s753_s24 = sld [smem:[#allocation2 + $0x2c]]  ;;  %v154_v18 = vadd.f32 %v152_v48, %v149_v6  ;;  %v215_v23 = vstv %s711_s18 }
  0x25   :  { %s756_s25 = sld [smem:[#allocation2 + $0x2d]]  ;;  %v155_v19 = vadd.f32 %v153_v49, %v150_v7  ;;  %v185_v24 = vadd.f32 %v676_v33, %v180_v12  ;;  %v760_v25 = vmul.f32 %v666_v29, %v259_v14  ;;  %v290_v26 = vstv %s719_s19 }
  0x26   :  { %v90_v27 = vmax.f32 %v88_v11, 0.0  ;;  %s763_s26 = sld [smem:[#allocation2 + $0x2e]]  ;;  %v186_v28 = vadd.f32 %v679_v34, %v181_v13  ;;  %v767_v31 = vmul.f32 %v671_v30, %v259_v14  ;;  %v770_v32 = vmul.f32 %v284_v20, %v608_v0 }
  0x27   :  { %v91_v35 = vmax.f32 %v89_v15, 0.0  ;;  %v93_v33 = vstv %s727_s20  ;;  %s773_s27 = sld [smem:[#allocation2 + $0x2f]]  ;;  %v216_v36 = vadd.f32 %v215_v23, %v686_v37  ;;  %v777_v43 = vmul.f32 %v284_v20, %v613_v1 }
  0x28   :  { %v120_v44 = vmax.f32 %v118_v21, 0.0  ;;  %v121_v45 = vmax.f32 %v119_v22, 0.0  ;;  %v156_v34 = vmax.f32 %v154_v18, 0.0  ;;  %s779_s28 = sld [smem:[#allocation2 + $0x30]]  ;;  %v784_v46 = vmul.f32 %v620_v5, %v290_v26 }
  0x29   :  { %v97_v47 = vstv %s731_s21  ;;  %v123_v48 = vstv %s744_s23  ;;  %v157_v49 = vmax.f32 %v155_v19, 0.0  ;;  %v190_v51 = vadd.f32 %v717_v50, %v185_v24  ;;  %s789_s29 = sld [smem:[#allocation2 + $0x31]] }
  0x2a   :  { %v94_v37 = vmul.f32 %v93_v33, %v90_v27  ;;  %v129_v52 = vstv %s753_s24  ;;  %v191_v53 = vadd.f32 %v189_v54, %v186_v28  ;;  %s792_s30 = sld [smem:[#allocation2 + $0x32]]  ;;  %v217_v55 = vadd.f32 %v215_v23, %v689_v38 }
  0x2b   :  { %v95_v56 = vmul.f32 %v93_v33, %v91_v35  ;;  %v101_v57 = vstv %s739_s22  ;;  %v135_v58 = vstv %s756_s25  ;;  %s797_s3 = sld [smem:[#allocation2 + $0x33]]  ;;  %v221_v59 = vadd.f32 %v694_v39, %v216_v36 }
  0x2c   :  { %v98_v50 = vmul.f32 %v97_v47, %v90_v27  ;;  %v99_v60 = vmul.f32 %v97_v47, %v91_v35  ;;  %v124_v61 = vmul.f32 %v123_v48, %v120_v44  ;;  %v125_v62 = vmul.f32 %v123_v48, %v121_v45  ;;  %s804_s4 = sld [smem:[#allocation2 + $0x34]] }
  0x2d   :  { %v130_v63 = vmul.f32 %v129_v52, %v120_v44  ;;  %v131_v2 = vmul.f32 %v129_v52, %v121_v45  ;;  %v159_v54 = vstv %s763_s26  ;;  %v192_v3 = vmax.f32 %v190_v51, 0.0  ;;  %s806_s5 = sld [smem:[#allocation2 + $0x35]] }
  0x2e   :  { %v102_v4 = vmul.f32 %v101_v57, %v90_v27  ;;  %v103_v6 = vmul.f32 %v101_v57, %v91_v35  ;;  %v136_v38 = vmul.f32 %v135_v58, %v120_v44  ;;  %v165_v7 = vstv %s773_s27  ;;  %s808_s6 = sld [smem:[#allocation2 + $0x36]] }
  0x2f   :  { %v137_v11 = vmul.f32 %v135_v58, %v121_v45  ;;  %v171_v12 = vstv %s779_s28  ;;  %v193_v13 = vmax.f32 %v191_v53, 0.0  ;;  %v222_v14 = vadd.f32 %v697_v40, %v217_v55  ;;  %s812_s7 = sld [smem:[#allocation2 + $0x1a]] }
  0x30   :  { %v126_v39 = vadd.f32 %v124_v61, %v94_v37  ;;  %v127_v15 = vadd.f32 %v125_v62, %v95_v56  ;;  %v160_v20 = vmul.f32 %v159_v54, %v156_v34  ;;  %v161_v21 = vmul.f32 %v159_v54, %v157_v49  ;;  %s817_s8 = sld [smem:[#allocation2 + $0x24]] }
  0x31   :  { %v132_v22 = vadd.f32 %v130_v63, %v98_v50  ;;  %v133_v18 = vadd.f32 %v131_v2, %v99_v60  ;;  %v166_v23 = vmul.f32 %v165_v7, %v156_v34  ;;  %v167_v19 = vmul.f32 %v165_v7, %v157_v49  ;;  %s820_s9 = sld [smem:[#allocation2 + $0x7]] }
  0x32   :  { %v138_v24 = vadd.f32 %v136_v38, %v102_v4  ;;  %v172_v27 = vmul.f32 %v171_v12, %v156_v34  ;;  %v195_v28 = vstv %s789_s29  ;;  %v251_v40 = vstv %s725_s0  ;;  %s822_s10 = sld [smem:[#allocation2 + $0x11]] }
  0x33   :  { %v139_v35 = vadd.f32 %v137_v11, %v103_v6  ;;  %v201_v33 = vstv %s792_s30  ;;  %v207_v36 = vstv %s797_s3  ;;  %v226_v44 = vadd.f32 %v734_v9, %v221_v59  ;;  %s824_s11 = sld [smem:[#allocation2 + $0x1b]] }
  0x34   :  { %v162_v45 = vadd.f32 %v160_v20, %v126_v39  ;;  %v163_v47 = vadd.f32 %v161_v21, %v127_v15  ;;  %v173_v48 = vmul.f32 %v171_v12, %v157_v49  ;;  %v227_v51 = vadd.f32 %v737_v10, %v222_v14  ;;  %s830_s12 = sld [smem:[#allocation2 + $0x37]] }
  0x35   :  { %v168_v34 = vadd.f32 %v166_v23, %v132_v22  ;;  %v169_v37 = vadd.f32 %v167_v19, %v133_v18  ;;  %v196_v52 = vmul.f32 %v195_v28, %v192_v3  ;;  %v197_v53 = vmul.f32 %v195_v28, %v193_v13  ;;  %s838_s13 = sld [smem:[#allocation2 + $0x38]] }
  0x36   :  { %v174_v9 = vadd.f32 %v172_v27, %v138_v24  ;;  %v202_v55 = vmul.f32 %v201_v33, %v192_v3  ;;  %v203_v56 = vmul.f32 %v201_v33, %v193_v13  ;;  %v208_v57 = vmul.f32 %v207_v36, %v192_v3  ;;  %s840_s14 = sld [smem:[#allocation2 + $0x39]] }
  0x37   :  { %v228_v49 = vmax.f32 %v226_v44, 0.0  ;;  %v229_v10 = vmax.f32 %v227_v51, 0.0  ;;  %v252_v58 = vadd.f32 %v251_v40, %v700_v41  ;;  %v253_v59 = vadd.f32 %v251_v40, %v703_v42  ;;  %s842_s15 = sld [smem:[#allocation2 + $0x3a]] }
  0x38   :  { %v175_v50 = vadd.f32 %v173_v48, %v139_v35  ;;  %v231_v60 = vstv %s804_s4  ;;  %v237_v61 = vstv %s806_s5  ;;  %v292_v62 = vmul.f32 %v627_v8, %v290_v26  ;;  %s844_s16 = sld [smem:[#allocation2 + $0x25]] }
  0x39   :  { %v198_v63 = vadd.f32 %v196_v52, %v162_v45  ;;  %v243_v2 = vstv %s808_s6  ;;  %v257_v54 = vadd.f32 %v747_v16, %v252_v58  ;;  %v258_v3 = vadd.f32 %v750_v17, %v253_v59  ;;  %s853_s1 = sld [smem:[#allocation2 + $0x3b]] }
  0x3a   :  { %v199_v41 = vadd.f32 %v197_v53, %v163_v47  ;;  %v204_v42 = vadd.f32 %v202_v55, %v168_v34  ;;  %v205_v4 = vadd.f32 %v203_v56, %v169_v37  ;;  %v209_v6 = vmul.f32 %v207_v36, %v193_v13  ;;  %s857_s17 = sld [smem:[#allocation2 + $0x3c]] }
  0x3b   :  { %v210_v38 = vadd.f32 %v208_v57, %v174_v9  ;;  %v232_v7 = vmul.f32 %v231_v60, %v228_v49  ;;  %v233_v11 = vmul.f32 %v231_v60, %v229_v10  ;;  %v238_v26 = vmul.f32 %v237_v61, %v228_v49  ;;  %s859_s18 = sld [smem:[#allocation2 + $0x8]] }
  0x3c   :  { %v239_v16 = vmul.f32 %v237_v61, %v229_v10  ;;  %v244_v12 = vmul.f32 %v243_v2, %v228_v49  ;;  %v287_v17 = vstv %s817_s8  ;;  %v295_v14 = vstv %s812_s7  ;;  %s864_s19 = sld [smem:[#allocation2 + $0x12]] }
  0x3d   :  { %v262_v39 = vadd.f32 %v760_v25, %v257_v54  ;;  %v263_v15 = vadd.f32 %v767_v31, %v258_v3  ;;  %v288_v13 = vadd.f32 %v287_v17, %v770_v32  ;;  %v289_v20 = vadd.f32 %v287_v17, %v777_v43  ;;  %s870_s0 = sld [smem:[#allocation2 + $0x1c]] }
  0x3e   :  { %v211_v21 = vadd.f32 %v209_v6, %v175_v50  ;;  %v245_v22 = vmul.f32 %v243_v2, %v229_v10  ;;  %v296_v18 = vmul.f32 %v666_v29, %v295_v14  ;;  %v234_v23 = vadd.f32 %v232_v7, %v198_v63  ;;  %s875_s20 = sld [smem:[#allocation2 + $0x26]] }
  0x3f   :  { %v240_v19 = vadd.f32 %v238_v26, %v204_v42  ;;  %v297_v24 = vmul.f32 %v671_v30, %v295_v14  ;;  %v235_v25 = vadd.f32 %v233_v11, %v199_v41  ;;  %v241_v27 = vadd.f32 %v239_v16, %v205_v4  ;;  %s884_s21 = sld [smem:[#allocation2 + $0x9]] }
  0x40   :  { %v293_v31 = vadd.f32 %v784_v46, %v288_v13  ;;  %v294_v32 = vadd.f32 %v292_v62, %v289_v20  ;;  %v861_v43 = vadd.f32 %v244_v12, %v210_v38  ;;  %v264_v28 = vmax.f32 %v262_v39, 0.0  ;;  %s889_s22 = sld [smem:[#allocation2 + $0x3d]] }
  0x41   :  { %v265_v40 = vmax.f32 %v263_v15, 0.0  ;;  %v267_v35 = vstv %s830_s12  ;;  %v866_v33 = vadd.f32 %v245_v22, %v211_v21  ;;  %v273_v36 = vstv %s838_s13  ;;  %s891_s23 = sld [smem:[#allocation2 + $0x3e]] }
  0x42   :  { %v279_v46 = vstv %s840_s14  ;;  %v298_v44 = vadd.f32 %v296_v18, %v293_v31  ;;  %v299_v45 = vadd.f32 %v297_v24, %v294_v32  ;;  %v303_v47 = vstv %s842_s15  ;;  %s893_s24 = sld [smem:[#allocation2 + $0x13]] }
  0x43   :  { %v320_v48 = vstv %s820_s9  ;;  %v326_v51 = vstv %s822_s10  ;;  %v323_v52 = vstv %s844_s16  ;;  %v331_v53 = vstv %s824_s11  ;;  %s896_s25 = sld [smem:[#allocation2 + $0x3f]] }
  0x44   :  { %v321_v34 = vmul.f32 %v320_v48, %v608_v0  ;;  %v322_v37 = vmul.f32 %v320_v48, %v613_v1  ;;  %v268_v9 = vmul.f32 %v267_v35, %v264_v28  ;;  %v269_v55 = vmul.f32 %v267_v35, %v265_v40  ;;  %s900_s26 = sld [smem:[#allocation2 + $0x27]] }
  0x45   :  { %v327_v56 = vmul.f32 %v620_v5, %v326_v51  ;;  %v328_v57 = vmul.f32 %v627_v8, %v326_v51  ;;  %v274_v49 = vmul.f32 %v273_v36, %v264_v28  ;;  %v275_v10 = vmul.f32 %v273_v36, %v265_v40  ;;  %s905_s27 = sld [smem:[#allocation2 + $0x40]] }
  0x46   :  { %v300_v58 = vmax.f32 %v298_v44, 0.0  ;;  %v309_v59 = vstv %s853_s1  ;;  %v324_v50 = vadd.f32 %v323_v52, %v321_v34  ;;  %v325_v60 = vadd.f32 %v323_v52, %v322_v37  ;;  %s907_s28 = sld [smem:[#allocation2 + $0x1d]] }
  0x47   :  { %v332_v61 = vmul.f32 %v666_v29, %v331_v53  ;;  %v333_v62 = vmul.f32 %v671_v30, %v331_v53  ;;  %v280_v63 = vmul.f32 %v279_v46, %v264_v28  ;;  %v281_v2 = vmul.f32 %v279_v46, %v265_v40  ;;  %s915_s29 = sld [smem:[#allocation2 + $0x41]] }
  0x48   :  { %v301_v54 = vmax.f32 %v299_v45, 0.0  ;;  %v315_v3 = vstv %s857_s17  ;;  %v270_v41 = vadd.f32 %v268_v9, %v234_v23  ;;  %v271_v42 = vadd.f32 %v269_v55, %v235_v25  ;;  %s919_s30 = sld [smem:[#allocation2 + $0x42]] }
  0x49   :  { %v329_v4 = vadd.f32 %v327_v56, %v324_v50  ;;  %v330_v6 = vadd.f32 %v328_v57, %v325_v60  ;;  %v276_v38 = vadd.f32 %v274_v49, %v240_v19  ;;  %v277_v7 = vadd.f32 %v275_v10, %v241_v27  ;;  %s927_s3 = sld [smem:[#allocation2 + $0x43]] }
  0x4a   :  { %v304_v11 = vmul.f32 %v303_v47, %v300_v58  ;;  %v356_v26 = vstv %s859_s18  ;;  %v305_v39 = vmul.f32 %v303_v47, %v301_v54  ;;  %v359_v15 = vstv %s875_s20  ;;  %s930_s4 = sld [smem:[#allocation2 + $0x44]] }
  0x4b   :  { %v334_v16 = vadd.f32 %v332_v61, %v329_v4  ;;  %v335_v12 = vadd.f32 %v333_v62, %v330_v6  ;;  %v357_v17 = vmul.f32 %v356_v26, %v608_v0  ;;  %v358_v14 = vmul.f32 %v356_v26, %v613_v1  ;;  %s934_s5 = sld [smem:[#allocation2 + $0x45]] }
  0x4c   :  { %v362_v13 = vstv %s864_s19  ;;  %v367_v20 = vstv %s870_s0  ;;  %v310_v21 = vmul.f32 %v309_v59, %v300_v58  ;;  %v311_v22 = vmul.f32 %v309_v59, %v301_v54  ;;  %s936_s6 = sld [smem:[#allocation2 + $0x46]] }
  0x4d   :  { %v360_v18 = vadd.f32 %v359_v15, %v357_v17  ;;  %v361_v23 = vadd.f32 %v359_v15, %v358_v14  ;;  %v363_v19 = vmul.f32 %v620_v5, %v362_v13  ;;  %v364_v24 = vmul.f32 %v627_v8, %v362_v13  ;;  %s941_s7 = sld [smem:[#allocation2 + $0x47]] }
  0x4e   :  { %v368_v25 = vmul.f32 %v666_v29, %v367_v20  ;;  %v369_v27 = vmul.f32 %v671_v30, %v367_v20  ;;  %v282_v31 = vadd.f32 %v280_v63, %v861_v43  ;;  %v283_v32 = vadd.f32 %v281_v2, %v866_v33  ;;  %s945_s8 = sld [smem:[#allocation2 + $0x48]] }
  0x4f   :  { %v336_v28 = vmax.f32 %v334_v16, 0.0  ;;  %v337_v40 = vmax.f32 %v335_v12, 0.0  ;;  %v316_v35 = vmul.f32 %v315_v3, %v300_v58  ;;  %v339_v36 = vstv %s889_s22 }
  0x50   :  { %v365_v46 = vadd.f32 %v363_v19, %v360_v18  ;;  %v366_v44 = vadd.f32 %v364_v24, %v361_v23  ;;  %v306_v45 = vadd.f32 %v304_v11, %v270_v41  ;;  %v307_v47 = vadd.f32 %v305_v39, %v271_v42 }
  0x51   :  { %v317_v48 = vmul.f32 %v315_v3, %v301_v54  ;;  %v345_v51 = vstv %s891_s23  ;;  %v312_v43 = vadd.f32 %v310_v21, %v276_v38  ;;  %v313_v33 = vadd.f32 %v311_v22, %v277_v7 }
  0x52   :  { %v370_v34 = vadd.f32 %v368_v25, %v365_v46  ;;  %v371_v37 = vadd.f32 %v369_v27, %v366_v44  ;;  %v340_v52 = vmul.f32 %v339_v36, %v336_v28  ;;  %v341_v53 = vmul.f32 %v339_v36, %v337_v40 }
  0x53   :  { %v351_v9 = vstv %s896_s25  ;;  %v392_v55 = vstv %s884_s21  ;;  %v346_v56 = vmul.f32 %v345_v51, %v336_v28  ;;  %v395_v10 = vstv %s900_s26 }
  0x54   :  { %v393_v57 = vmul.f32 %v392_v55, %v608_v0  ;;  %v394_v49 = vmul.f32 %v392_v55, %v613_v1  ;;  %v318_v58 = vadd.f32 %v316_v35, %v282_v31  ;;  %v319_v59 = vadd.f32 %v317_v48, %v283_v32 }
  0x55   :  { %v372_v50 = vmax.f32 %v370_v34, 0.0  ;;  %v375_v60 = vstv %s905_s27  ;;  %v347_v61 = vmul.f32 %v345_v51, %v337_v40  ;;  %v352_v62 = vmul.f32 %v351_v9, %v336_v28 }
  0x56   :  { %v373_v63 = vmax.f32 %v371_v37, 0.0  ;;  %v398_v2 = vstv %s893_s24  ;;  %v381_v54 = vstv %s915_s29  ;;  %v396_v3 = vadd.f32 %v395_v10, %v393_v57 }
  0x57   :  { %v397_v0 = vadd.f32 %v395_v10, %v394_v49  ;;  %v403_v41 = vstv %s907_s28  ;;  %v342_v1 = vadd.f32 %v340_v52, %v306_v45  ;;  %v343_v42 = vadd.f32 %v341_v53, %v307_v47 }
  0x58   :  { %v348_v4 = vadd.f32 %v346_v56, %v312_v43  ;;  %v353_v6 = vmul.f32 %v351_v9, %v337_v40  ;;  %v376_v38 = vmul.f32 %v375_v60, %v372_v50  ;;  %v387_v7 = vstv %s919_s30 }
  0x59   :  { %v399_v11 = vmul.f32 %v620_v5, %v398_v2  ;;  %v400_v26 = vmul.f32 %v627_v8, %v398_v2  ;;  %v377_v16 = vmul.f32 %v375_v60, %v373_v63  ;;  %v382_v12 = vmul.f32 %v381_v54, %v372_v50 }
  0x5a   :  { %v404_v17 = vmul.f32 %v666_v29, %v403_v41  ;;  %v405_v14 = vmul.f32 %v671_v30, %v403_v41  ;;  %v349_v39 = vadd.f32 %v347_v61, %v313_v33  ;;  %v383_v15 = vmul.f32 %v381_v54, %v373_v63 }
  0x5b   :  { %v401_v13 = vadd.f32 %v399_v11, %v396_v3  ;;  %v402_v20 = vadd.f32 %v400_v26, %v397_v0  ;;  %v354_v5 = vadd.f32 %v352_v62, %v318_v58  ;;  %v355_v21 = vadd.f32 %v353_v6, %v319_v59 }
  0x5c   :  { %v388_v8 = vmul.f32 %v387_v7, %v372_v50  ;;  %v389_v22 = vmul.f32 %v387_v7, %v373_v63  ;;  %v411_v19 = vstv %s927_s3  ;;  %v378_v24 = vadd.f32 %v376_v38, %v342_v1 }
  0x5d   :  { %v406_v18 = vadd.f32 %v404_v17, %v401_v13  ;;  %v407_v23 = vadd.f32 %v405_v14, %v402_v20  ;;  %v379_v29 = vadd.f32 %v377_v16, %v343_v42  ;;  %v384_v30 = vadd.f32 %v382_v12, %v348_v4 }
  0x5e   :  { %v417_v25 = vstv %s930_s4  ;;  %v385_v27 = vadd.f32 %v383_v15, %v349_v39  ;;  %v423_v28 = vstv %s934_s5  ;;  %v390_v40 = vadd.f32 %v388_v8, %v354_v5 }
  0x5f   :  { %v408_v31 = vmax.f32 %v406_v18, 0.0  ;;  %v409_v32 = vmax.f32 %v407_v23, 0.0  ;;  %v391_v35 = vadd.f32 %v389_v22, %v355_v21  ;;  %v429_v36 = vstv %s936_s6 }
  0x60   :  { %v439_v43 = vstv %s941_s7  ;;  %v450_v33 = vstv %s945_s8 }
  0x61   :  { %v412_v46 = vmul.f32 %v411_v19, %v408_v31  ;;  %v413_v44 = vmul.f32 %v411_v19, %v409_v32  ;;  %v418_v45 = vmul.f32 %v417_v25, %v408_v31  ;;  %v419_v47 = vmul.f32 %v417_v25, %v409_v32 }
  0x62   :  { %v424_v48 = vmul.f32 %v423_v28, %v408_v31  ;;  %v425_v51 = vmul.f32 %v423_v28, %v409_v32 }
  0x63   :  { %v414_v34 = vadd.f32 %v412_v46, %v378_v24  ;;  %v415_v37 = vadd.f32 %v413_v44, %v379_v29  ;;  %v420_v52 = vadd.f32 %v418_v45, %v384_v30  ;;  %v421_v53 = vadd.f32 %v419_v47, %v385_v27 }
  0x64   :  { %v426_v9 = vadd.f32 %v424_v48, %v390_v40  ;;  %v427_v55 = vadd.f32 %v425_v51, %v391_v35 }
  0x65   :  { %v430_v56 = vadd.f32 %v429_v36, %v414_v34  ;;  %v431_v57 = vadd.f32 %v429_v36, %v415_v37  ;;  %v440_v49 = vadd.f32 %v439_v43, %v420_v52  ;;  %v441_v10 = vadd.f32 %v439_v43, %v421_v53 }
  0x66   :  { %v451_v58 = vadd.f32 %v450_v33, %v426_v9  ;;  %v452_v59 = vadd.f32 %v450_v33, %v427_v55 }
  0x67   :  { %v432_v50 = vmax.f32 %v430_v56, 0.0  ;;  %v433_v60 = vmax.f32 %v431_v57, 0.0  ;;  %v442_v61 = vmax.f32 %v440_v49, 0.0  ;;  %v443_v62 = vmax.f32 %v441_v10, 0.0 }
  0x68   :  { %v453_v63 = vmax.f32 %v451_v58, 0.0  ;;  %v454_v2 = vmax.f32 %v452_v59, 0.0 }
  0x69   :  { %v434_v54 = vmin.f32 %v432_v50, 1.0  ;;  %v435_v3 = vmin.f32 %v433_v60, 1.0  ;;  %v444_v0 = vmin.f32 %v442_v61, 1.0  ;;  %v445_v41 = vmin.f32 %v443_v62, 1.0 }
  0x6a   :  { %v455_v1 = vmin.f32 %v453_v63, 1.0  ;;  %v456_v42 = vmin.f32 %v454_v2, 1.0 }
  0x6b   :  { %436 = vst [vmem:[%s973_s2] sm:$0xff] %v434_v54 }
  0x6c   :  { %437 = vst [vmem:[%s973_s2 + $0x8] sm:$0xff] %v435_v3 }
  0x6d   :  { %544 = vst [vmem:[%s973_s2 + $0x10] sm:$0xff] %v444_v0 }
  0x6e   :  { %545 = vst [vmem:[%s973_s2 + $0x18] sm:$0xff] %v445_v41 }
  0x6f   :  { %547 = vst [vmem:[%s973_s2 + $0x20] sm:$0xff] %v455_v1 }
  0x70   :  { %548 = vst [vmem:[%s973_s2 + $0x28] sm:$0xff] %v456_v42 }
  0x71   :  { %464 = vsyncpa [#allocation3], 1 }

</bundles_post_ra>
